<compile_context>
chip_gen: v7x
topology: tpu7x:2x2x1
jax: 0.10.0
libtpu: 0.0.40
codegen_flags: <defaults>
</compile_context>

<pallas_src>
import jax
import jax.numpy as jnp
from jax.experimental import pallas as pl
from jax.experimental.pallas import tpu as pltpu


# ----------------------------------------------------------------------------
# Pallas kernel
# ----------------------------------------------------------------------------

def fused_block_kernel(x_ref, w1_ref, s1_ref, b1_ref, w2_ref, s2_ref, b2_ref,
                       o_ref, h_ref):
    """One CONV1D_DW_3x3 block: relu((relu(x@W1*s1+b1)) @ W2 * s2 + b2)."""
    # Hidden activation depends only on the M tile; compute it once (on the
    # first Cout-tile iteration) and keep it resident in VMEM scratch while the
    # inner (Cout-tile) grid axis runs.
    @pl.when(pl.program_id(1) == 0)
    def _():
        h = jnp.dot(x_ref[...], w1_ref[...], preferred_element_type=jnp.float32)
        h = jnp.maximum(h * s1_ref[...] + b1_ref[...], 0.0)
        h_ref[...] = h.astype(h_ref.dtype)

    y = jnp.dot(h_ref[...], w2_ref[...], preferred_element_type=jnp.float32)
    y = jnp.maximum(y * s2_ref[...] + b2_ref[...], 0.0)
    o_ref[...] = y.astype(o_ref.dtype)


# ----------------------------------------------------------------------------
# Wrapper
# ----------------------------------------------------------------------------

def _round_up(v, m):
    return (v + m - 1) // m * m


def _pick_tm(m):
    # Biggest sublane-aligned M tile that does not overshoot the problem.
    for t in (1024, 512, 256, 128, 64, 32, 16, 8):
        if m >= t:
            return t
    return 8


def _pick_tn(cout_p):
    # Lane-dense output tile; keep W2 column tiles <= 512 lanes wide.
    for t in (512, 256, 128):
        if cout_p >= t and cout_p % t == 0:
            return t
    return cout_p


@jax.jit
def conv1d_dw_3x3(x, w1, scale1, shift1, w2, scale2, shift2):
    """x: (M, Cin) f32.  w1: (Cin, Cin).  w2: (Cin, Cout).  scale/shift: per-channel."""
    m, cin = x.shape
    cout = w2.shape[1]

    cin_p = _round_up(cin, 128)
    cout_p = _round_up(cout, 128)
    tm = _pick_tm(m)
    m_p = _round_up(m, tm)
    tn = _pick_tn(cout_p)

    # Pad to lane/sublane-aligned shapes. Padded hidden/output channels come
    # out as relu(0*scale + 0) = 0 (weights/shifts zero-padded, scales padded
    # with ones), so slicing at the end recovers exact semantics.
    xp = jnp.pad(x.astype(jnp.bfloat16), ((0, m_p - m), (0, cin_p - cin)))
    w1p = jnp.pad(w1.astype(jnp.bfloat16), ((0, cin_p - cin), (0, cin_p - cin)))
    w2p = jnp.pad(w2.astype(jnp.bfloat16), ((0, cin_p - cin), (0, cout_p - cout)))
    s1p = jnp.pad(scale1.astype(jnp.float32).reshape(1, cin),
                  ((0, 0), (0, cin_p - cin)), constant_values=1.0)
    b1p = jnp.pad(shift1.astype(jnp.float32).reshape(1, cin),
                  ((0, 0), (0, cin_p - cin)))
    s2p = jnp.pad(scale2.astype(jnp.float32).reshape(1, cout),
                  ((0, 0), (0, cout_p - cout)), constant_values=1.0)
    b2p = jnp.pad(shift2.astype(jnp.float32).reshape(1, cout),
                  ((0, 0), (0, cout_p - cout)))

    out = pl.pallas_call(
        fused_block_kernel,
        out_shape=jax.ShapeDtypeStruct((m_p, cout_p), jnp.float32),
        grid_spec=pltpu.PrefetchScalarGridSpec(
            num_scalar_prefetch=0,
            grid=(m_p // tm, cout_p // tn),
            in_specs=[
                pl.BlockSpec((tm, cin_p), lambda i, j: (i, 0)),      # x row tile
                pl.BlockSpec((cin_p, cin_p), lambda i, j: (0, 0)),   # W1 (resident)
                pl.BlockSpec((1, cin_p), lambda i, j: (0, 0)),       # scale1
                pl.BlockSpec((1, cin_p), lambda i, j: (0, 0)),       # shift1
                pl.BlockSpec((cin_p, tn), lambda i, j: (0, j)),      # W2 column tile
                pl.BlockSpec((1, tn), lambda i, j: (0, j)),          # scale2
                pl.BlockSpec((1, tn), lambda i, j: (0, j)),          # shift2
            ],
            out_specs=pl.BlockSpec((tm, tn), lambda i, j: (i, j)),
            scratch_shapes=[pltpu.VMEM((tm, cin_p), jnp.bfloat16)],  # hidden act
        ),
        compiler_params=pltpu.CompilerParams(
            dimension_semantics=("parallel", "arbitrary")),
    )(xp, w1p, s1p, b1p, w2p, s2p, b2p)
    return out[:m, :cout]


# ----------------------------------------------------------------------------
# Parameter construction (mirrors PyTorch module init, eval mode)
# ----------------------------------------------------------------------------

def fold_bn(gamma, beta, running_mean, running_var, eps):
    scale = gamma / jnp.sqrt(running_var + eps)
    shift = beta - running_mean * scale
    return scale, shift


def make_params(key, inplanes, outplanes):
    k1, k2 = jax.random.split(key)
    # nn.Linear default init: U(-1/sqrt(fan_in), 1/sqrt(fan_in)), fan_in = inplanes.
    bound = 1.0 / (inplanes ** 0.5)
    w1 = jax.random.uniform(k1, (inplanes, inplanes), jnp.float32, -bound, bound)
    w2 = jax.random.uniform(k2, (inplanes, outplanes), jnp.float32, -bound, bound)
    eps = 0.001
    # BatchNorm1d at init / eval: gamma=1, beta=0, running_mean=0, running_var=1.
    s1, sh1 = fold_bn(jnp.ones((inplanes,)), jnp.zeros((inplanes,)),
                      jnp.zeros((inplanes,)), jnp.ones((inplanes,)), eps)
    s2, sh2 = fold_bn(jnp.ones((outplanes,)), jnp.zeros((outplanes,)),
                      jnp.zeros((outplanes,)), jnp.ones((outplanes,)), eps)
    return w1, s1, sh1, w2, s2, sh2


def reference(x, w1, s1, sh1, w2, s2, sh2):
    h = jnp.maximum(x @ w1 * s1 + sh1, 0.0)
    return jnp.maximum(h @ w2 * s2 + sh2, 0.0)


# ----------------------------------------------------------------------------
# Main
# ----------------------------------------------------------------------------

if __name__ == "__main__":
    key = jax.random.PRNGKey(0)
    pkey, xkey = jax.random.split(key)

    batch, inplanes, outplanes = 8, 64, 96
    w1, s1, sh1, w2, s2, sh2 = make_params(pkey, inplanes, outplanes)
    x = jax.random.normal(xkey, (batch, inplanes), jnp.float32)

    out = conv1d_dw_3x3(x, w1, s1, sh1, w2, s2, sh2)
    out = jax.block_until_ready(out)
    assert out.shape == (batch, outplanes), out.shape

    ref = reference(x, w1, s1, sh1, w2, s2, sh2)
    max_err = float(jnp.max(jnp.abs(out - ref)))
    assert max_err < 5e-2, f"max abs error too large: {max_err}"

    print("KERNEL_OK")
</pallas_src>

<mosaic_0001>
module attributes {stable_mosaic.version = 11 : i64} {
  func.func @fused_block_kernel(%arg0: i32, %arg1: i32, %arg2: memref<8x128xbf16, #tpu.memory_space<vmem>>, %arg3: memref<128x128xbf16, #tpu.memory_space<vmem>>, %arg4: memref<1x128xf32, #tpu.memory_space<vmem>>, %arg5: memref<1x128xf32, #tpu.memory_space<vmem>>, %arg6: memref<128x128xbf16, #tpu.memory_space<vmem>>, %arg7: memref<1x128xf32, #tpu.memory_space<vmem>>, %arg8: memref<1x128xf32, #tpu.memory_space<vmem>>, %arg9: memref<8x128xf32, #tpu.memory_space<vmem>>, %arg10: memref<8x128xbf16, #tpu.memory_space<vmem>>) attributes {dimension_semantics = [#tpu.dimension_semantics<parallel>, #tpu.dimension_semantics<arbitrary>], iteration_bounds = array<i64: 1, 1>, scalar_prefetch = 0 : i64, scratch_operands = 1 : i64, tpu.core_type = #tpu.core_type<tc>, window_params = [{transform_indices = @transform_0, window_bounds = array<i64: 8, 128>}, {pipeline_mode = #tpu.pipeline_mode<synchronous>, transform_indices = @transform_1, window_bounds = array<i64: 128, 128>}, {pipeline_mode = #tpu.pipeline_mode<synchronous>, transform_indices = @transform_2, window_bounds = array<i64: 1, 128>}, {pipeline_mode = #tpu.pipeline_mode<synchronous>, transform_indices = @transform_3, window_bounds = array<i64: 1, 128>}, {transform_indices = @transform_4, window_bounds = array<i64: 128, 128>}, {transform_indices = @transform_5, window_bounds = array<i64: 1, 128>}, {transform_indices = @transform_6, window_bounds = array<i64: 1, 128>}, {transform_indices = @transform_7, window_bounds = array<i64: 8, 128>}]} {
    %c0_i32 = arith.constant 0 : i32
    %0 = arith.cmpi eq, %arg1, %c0_i32 : i32
    %1 = arith.extui %0 : i1 to i32
    %c0_i32_0 = arith.constant 0 : i32
    %2 = arith.cmpi ne, %1, %c0_i32_0 : i32
    scf.if %2 {
      %c0_11 = arith.constant 0 : index
      %c0_12 = arith.constant 0 : index
      %15 = vector.load %arg2[%c0_11, %c0_12] : memref<8x128xbf16, #tpu.memory_space<vmem>>, vector<8x128xbf16>
      %c0_13 = arith.constant 0 : index
      %c0_14 = arith.constant 0 : index
      %16 = vector.load %arg3[%c0_13, %c0_14] : memref<128x128xbf16, #tpu.memory_space<vmem>>, vector<128x128xbf16>
      %cst_15 = arith.constant dense<0.000000e+00> : vector<8x128xf32>
      %17 = tpu.matmul %15, %16, %cst_15 {dimension_numbers = #tpu.dot_dimension_numbers<[1], [0], [0], [1], [0, 0, 1, 1], [], []>} : vector<8x128xbf16>, vector<128x128xbf16>, vector<8x128xf32> -> vector<8x128xf32>
      %c0_16 = arith.constant 0 : index
      %c0_17 = arith.constant 0 : index
      %18 = vector.load %arg4[%c0_16, %c0_17] : memref<1x128xf32, #tpu.memory_space<vmem>>, vector<1x128xf32>
      %19 = vector.broadcast %18 : vector<1x128xf32> to vector<8x128xf32>
      %20 = arith.mulf %17, %19 : vector<8x128xf32>
      %c0_18 = arith.constant 0 : index
      %c0_19 = arith.constant 0 : index
      %21 = vector.load %arg5[%c0_18, %c0_19] : memref<1x128xf32, #tpu.memory_space<vmem>>, vector<1x128xf32>
      %22 = vector.broadcast %21 : vector<1x128xf32> to vector<8x128xf32>
      %23 = arith.addf %20, %22 : vector<8x128xf32>
      %cst_20 = arith.constant 0.000000e+00 : f32
      %24 = vector.broadcast %cst_20 : f32 to vector<8x128xf32>
      %25 = arith.maximumf %23, %24 : vector<8x128xf32>
      %26 = arith.truncf %25 : vector<8x128xf32> to vector<8x128xbf16>
      %c0_21 = arith.constant 0 : index
      %c0_22 = arith.constant 0 : index
      %27 = vector.load %arg10[%c0_21, %c0_22] : memref<8x128xbf16, #tpu.memory_space<vmem>>, vector<8x128xbf16>
      tpu.vector_store %arg10[%c0_21, %c0_22], %26 {strides = array<i32>} : memref<8x128xbf16, #tpu.memory_space<vmem>>, vector<8x128xbf16>,
    } else {
    }
    %c0 = arith.constant 0 : index
    %c0_1 = arith.constant 0 : index
    %3 = vector.load %arg10[%c0, %c0_1] : memref<8x128xbf16, #tpu.memory_space<vmem>>, vector<8x128xbf16>
    %c0_2 = arith.constant 0 : index
    %c0_3 = arith.constant 0 : index
    %4 = vector.load %arg6[%c0_2, %c0_3] : memref<128x128xbf16, #tpu.memory_space<vmem>>, vector<128x128xbf16>
    %cst = arith.constant dense<0.000000e+00> : vector<8x128xf32>
    %5 = tpu.matmul %3, %4, %cst {dimension_numbers = #tpu.dot_dimension_numbers<[1], [0], [0], [1], [0, 0, 1, 1], [], []>} : vector<8x128xbf16>, vector<128x128xbf16>, vector<8x128xf32> -> vector<8x128xf32>
    %c0_4 = arith.constant 0 : index
    %c0_5 = arith.constant 0 : index
    %6 = vector.load %arg7[%c0_4, %c0_5] : memref<1x128xf32, #tpu.memory_space<vmem>>, vector<1x128xf32>
    %7 = vector.broadcast %6 : vector<1x128xf32> to vector<8x128xf32>
    %8 = arith.mulf %5, %7 : vector<8x128xf32>
    %c0_6 = arith.constant 0 : index
    %c0_7 = arith.constant 0 : index
    %9 = vector.load %arg8[%c0_6, %c0_7] : memref<1x128xf32, #tpu.memory_space<vmem>>, vector<1x128xf32>
    %10 = vector.broadcast %9 : vector<1x128xf32> to vector<8x128xf32>
    %11 = arith.addf %8, %10 : vector<8x128xf32>
    %cst_8 = arith.constant 0.000000e+00 : f32
    %12 = vector.broadcast %cst_8 : f32 to vector<8x128xf32>
    %13 = arith.maximumf %11, %12 : vector<8x128xf32>
    %c0_9 = arith.constant 0 : index
    %c0_10 = arith.constant 0 : index
    %14 = vector.load %arg9[%c0_9, %c0_10] : memref<8x128xf32, #tpu.memory_space<vmem>>, vector<8x128xf32>
    tpu.vector_store %arg9[%c0_9, %c0_10], %13 {strides = array<i32>} : memref<8x128xf32, #tpu.memory_space<vmem>>, vector<8x128xf32>,
    return
  }
  func.func @transform_0(%arg0: i32, %arg1: i32) -> (i32, i32) {
    %c0_i32 = arith.constant 0 : i32
    %c0_i32_0 = arith.constant 0 : i32
    return %arg0, %c0_i32 : i32, i32
  }
  func.func @transform_1(%arg0: i32, %arg1: i32) -> (i32, i32) {
    %c0_i32 = arith.constant 0 : i32
    %c0_i32_0 = arith.constant 0 : i32
    %c0_i32_1 = arith.constant 0 : i32
    return %c0_i32, %c0_i32_0 : i32, i32
  }
  func.func @transform_2(%arg0: i32, %arg1: i32) -> (i32, i32) {
    %c0_i32 = arith.constant 0 : i32
    %c0_i32_0 = arith.constant 0 : i32
    %c0_i32_1 = arith.constant 0 : i32
    return %c0_i32, %c0_i32_0 : i32, i32
  }
  func.func @transform_3(%arg0: i32, %arg1: i32) -> (i32, i32) {
    %c0_i32 = arith.constant 0 : i32
    %c0_i32_0 = arith.constant 0 : i32
    %c0_i32_1 = arith.constant 0 : i32
    return %c0_i32, %c0_i32_0 : i32, i32
  }
  func.func @transform_4(%arg0: i32, %arg1: i32) -> (i32, i32) {
    %c0_i32 = arith.constant 0 : i32
    %c0_i32_0 = arith.constant 0 : i32
    return %c0_i32, %arg1 : i32, i32
  }
  func.func @transform_5(%arg0: i32, %arg1: i32) -> (i32, i32) {
    %c0_i32 = arith.constant 0 : i32
    %c0_i32_0 = arith.constant 0 : i32
    return %c0_i32, %arg1 : i32, i32
  }
  func.func @transform_6(%arg0: i32, %arg1: i32) -> (i32, i32) {
    %c0_i32 = arith.constant 0 : i32
    %c0_i32_0 = arith.constant 0 : i32
    return %c0_i32, %arg1 : i32, i32
  }
  func.func @transform_7(%arg0: i32, %arg1: i32) -> (i32, i32) {
    %c0_i32 = arith.constant 0 : i32
    return %arg0, %arg1 : i32, i32
  }
}

</mosaic_0001>

<bundles_post_ra>
// kernel: conv1d_dw_3x3.1
= control target key start
LH: loop header
LB: loop body
LE: loop exit
PB: predicated region body
PF: predicated region fallthrough
CT: control target
= control target key end

     0   :  { %v414_v1 = vmov 0.0   ;;  %vm415_vm0 = vmmov 0   ;;  %s532_s0 = inlined_call_operand.vmem [shape: bf16[8,128], index: 0, kind: input, shape index: {}]   ;;  %s533_s1 = inlined_call_operand.vmem [shape: bf16[128,128], index: 1, kind: input, shape index: {}]   ;;  %s534_s2 = inlined_call_operand.vmem [shape: f32[1,128], index: 2, kind: input, shape index: {}]   ;;  %s535_s3 = inlined_call_operand.vmem [shape: f32[1,128], index: 3, kind: input, shape index: {}]   ;;  %s536_s4 = inlined_call_operand.vmem [shape: bf16[128,128], index: 4, kind: input, shape index: {}]   ;;  %s537_s5 = inlined_call_operand.vmem [shape: f32[1,128], index: 5, kind: input, shape index: {}]   ;;  %s538_s6 = inlined_call_operand.vmem [shape: f32[1,128], index: 6, kind: input, shape index: {}]   ;;  %s539_s7 = inlined_call_operand.hbm [shape: f32[8,128], index: 7, kind: output, shape index: {}]  }
   0x1   :  { %v374_v0 = vld [vmem:[%s533_s1] sm:$0xff]   ;;  %331 = vmatprep.subr.bf16.mxu0 %v414_v1  ;;  %351 = vmatprep.subr.bf16.mxu1 %v414_v1  ;;  %v375_v2 = vld [vmem:[%s533_s1 + $0x8] sm:$0xff]   ;;  %v376_v3 = vld [vmem:[%s533_s1 + $0x10] sm:$0xff]  }
   0x2   :  { %332 = vmatpush3.bf16.msra.mxu0 %v374_v0  ;;  %347 = vmatprep.mubr.msk.bf16.mxu0 %vm415_vm0, %v414_v1  ;;  %v382_v4 = vld [vmem:[%s536_s4] sm:$0xff]   ;;  %v377_v5 = vld [vmem:[%s533_s1 + $0x18] sm:$0xff]   ;;  %v383_v6 = vld [vmem:[%s536_s4 + $0x8] sm:$0xff]  }
   0x3   :  { %333 = vmatprep.subr.bf16.mxu0 %v414_v1  ;;  %367 = vmatprep.mubr.msk.bf16.mxu1 %vm415_vm0, %v414_v1  ;;  %v378_v7 = vld [vmem:[%s533_s1 + $0x20] sm:$0xff]   ;;  %v384_v8 = vld [vmem:[%s536_s4 + $0x10] sm:$0xff]  }
   0x4   :  { %352 = vmatpush3.bf16.msra.mxu1 %v382_v4 }
   0x5   :  { %353 = vmatprep.subr.bf16.mxu1 %v414_v1 }
   0x6   :  { %334 = vmatpush3.bf16.msra.mxu0 %v375_v2 }
   0x7   :  { %335 = vmatprep.subr.bf16.mxu0 %v414_v1 }
   0x8   :  { %354 = vmatpush3.bf16.msra.mxu1 %v383_v6 }
   0xa   :  { %336 = vmatpush3.bf16.msra.mxu0 %v376_v3 }
   0xb   :  { %337 = vmatprep.subr.bf16.mxu0 %v414_v1 }
   0xe   :  { %338 = vmatpush3.bf16.msra.mxu0 %v377_v5 }
   0xf   :  { %339 = vmatprep.subr.bf16.mxu0 %v414_v1 }
  0x10   :  { %12 = vsyncpa [#allocation4], 0  ;;  %355 = vmatprep.subr.bf16.mxu1 %v414_v1  ;;  %v379_v9 = vld [vmem:[%s533_s1 + $0x28] sm:$0xff]   ;;  %v385_v10 = vld [vmem:[%s536_s4 + $0x18] sm:$0xff]  }
  0x11   :  { %356 = vmatpush3.bf16.msra.mxu1 %v384_v8  ;;  %v380_v11 = vld [vmem:[%s533_s1 + $0x30] sm:$0xff]   ;;  %v381_v12 = vld [vmem:[%s533_s1 + $0x38] sm:$0xff]   ;;  %v32_v13 = vld [vmem:[%s532_s0] sm:$0xf] }
  0x12   :  { %340 = vmatpush3.bf16.msra.mxu0 %v378_v7  ;;  %357 = vmatprep.subr.bf16.mxu1 %v414_v1  ;;  %v386_v14 = vld [vmem:[%s536_s4 + $0x20] sm:$0xff]   ;;  %v387_v15 = vld [vmem:[%s536_s4 + $0x28] sm:$0xff]   ;;  %v388_v16 = vld [vmem:[%s536_s4 + $0x30] sm:$0xff]  }
  0x13   :  { %341 = vmatprep.subr.bf16.mxu0 %v414_v1  ;;  %v389_v17 = vld [vmem:[%s536_s4 + $0x38] sm:$0xff]   ;;  %v301_v18 = vld [vmem:[%s534_s2] ss:$0 sm:$0xff] }
  0x14   :  { %v302_v20 = vld [vmem:[%s535_s3] ss:$0 sm:$0xff]  ;;  %s416_s3 = smov [#allocation3]  }
  0x15   :  { %358 = vmatpush3.bf16.msra.mxu1 %v385_v10  ;;  %v311_v29 = vld [vmem:[%s537_s5] ss:$0 sm:$0xff]  ;;  %s285_s16 = sshll.u32 %s416_s3, 4  ;;  %s286_s16 = int_to_ptr.vmem [resolvable:$true] %s285_s16 }
  0x16   :  { %342 = vmatpush3.bf16.msra.mxu0 %v379_v9  ;;  %359 = vmatprep.subr.bf16.mxu1 %v414_v1  ;;  %v312_v31 = vld [vmem:[%s538_s6] ss:$0 sm:$0xff]  ;;  %s390_s17 = scalar_lea.vmem %s286_s16, 128  ;;  %p395_p1 = scmp.lt.s32.totalorder %s286_s16, %s286_s16 }
  0x17   :  { %343 = vmatprep.subr.bf16.mxu0 %v414_v1  ;;  %p391_p0 = scmp.ne.s32.totalorder %s286_s16, %s390_s17  ;;  %p396_p2 = scmp.lt.s32.totalorder %s390_s17, %s390_s17 }
  0x19   :  { %360 = vmatpush3.bf16.msra.mxu1 %v386_v14  ;;  %p397_p3 = por %p396_p2, %p395_p1 }
  0x1a   :  { %344 = vmatpush3.bf16.msra.mxu0 %v380_v11  ;;  %361 = vmatprep.subr.bf16.mxu1 %v414_v1 }
  0x1b   :  { %345 = vmatprep.subr.bf16.mxu0 %v414_v1  ;;  %p398_p4 = pnand %p397_p3, %p391_p0 }
  0x1d   :  { %362 = vmatpush3.bf16.msra.mxu1 %v387_v15 }
  0x1e   :  { %346 = vmatpush3.bf16.msra.mxu0 %v381_v12  ;;  %363 = vmatprep.subr.bf16.mxu1 %v414_v1 }
  0x21   :  { %348 = vmatmul.mubr.bf16.vlgmr.msra.gmra.mrb[0].mxu0 %v32_v13  ;;  %364 = vmatpush3.bf16.msra.mxu1 %v388_v16 }
  0x22   :  { %365 = vmatprep.subr.bf16.mxu1 %v414_v1 }
  0x25   :  { %366 = vmatpush3.bf16.msra.mxu1 %v389_v17 }
  0xf4   :  { %v131_v19 = vpop.f32.mrb[0].mxu0 }
  0xf5   :  { %v144_v21 = vmul.f32 %v301_v18, %v131_v19  ;;  %v349_v22 = vpop.f32.mrb[1].mxu0 }
  0xf6   :  { %v134_v23 = vpop.f32.mrb[2].mxu0 }
  0xf7   :  { %v152_v24 = vadd.f32 %v302_v20, %v144_v21  ;;  %v350_v25 = vpop.f32.mrb[3].mxu0 }
  0xf9   :  { %v153_v26 = vmax.f32 %v152_v24, 0.0 }
  0xfb   :  { %v154_v27 = vpack.c.bf16 %v153_v26, %v153_v26 }
  0xfd   :  { %155 = vst [vmem:[#allocation2] sm:$0xf] %v154_v27 }
 0x104   :  { %v156_v28 = vld [vmem:[#allocation2] sm:$0xf] }
 0x105   :  { %368 = vmatmul.mubr.bf16.vlgmr.msra.gmra.mrb[0].mxu1 %v156_v28 }
 0x1d8   :  { %v255_v30 = vpop.f32.mrb[0].mxu1 }
 0x1d9   :  { %v268_v32 = vmul.f32 %v311_v29, %v255_v30  ;;  %v369_v33 = vpop.f32.mrb[1].mxu1 }
 0x1da   :  { %v258_v34 = vpop.f32.mrb[2].mxu1 }
 0x1db   :  { %v276_v35 = vadd.f32 %v312_v31, %v268_v32  ;;  %v370_v36 = vpop.f32.mrb[3].mxu1 }
 0x1dd   :  { %v277_v37 = vmax.f32 %v276_v35, 0.0 }
 0x1df   :  { %278 = vst [vmem:[#allocation3] sm:$0xff] %v277_v37 }
 0x1e0   :  { %401 = shalt.err (!%p398_p4)
}
 0x1e1   :  { %s402_s6 = scalar_lea.hbm %s539_s7, 128 }
 0x1e2   :  { %p403_p5 = scmp.ne.s32.totalorder %s539_s7, %s402_s6  ;;  %p406_p6 = scmp.lt.u32.totalorder %s402_s6, %s539_s7 }
 0x1e4   :  { %p408_p7 = pnand %p406_p6, %p403_p5 }
 0x1e6   :  { %411 = shalt.err (!%p408_p7)
}
 0x1e7   :  { %288 = dma.vmem_to_hbm [thread:$0]  %s286_s16, 128, %s539_s7, [#allocation4]  }
 0x1e8   :  { %412 = dma.done.wait [#allocation4], 128  }
 0x1e9   :  { %413 = vsyncadd [#allocation4], 4294967168 }
 0x1ea   :  { %292 = vsyncpa [#allocation4], 1 }

</bundles_post_ra>
